<compile_context>
chip_gen: v5e
topology: v5e:2x2
jax: 0.10.0
libtpu: 0.0.40
codegen_flags: <defaults>
</compile_context>

<pallas_src>
import jax
import jax.numpy as jnp
from jax.experimental import pallas as pl
from jax.experimental.pallas import tpu as pltpu

_LANE = 128
_TARGET_BLOCK_BYTES = 4 * 1024 * 1024  # ~4 MiB per block


def _abs_kernel(x_ref, o_ref):
    # Elementwise absolute value on the current VMEM block (VPU op).
    o_ref[...] = jnp.abs(x_ref[...])


def _packed_sublane(dtype) -> int:
    # Native packed sublane count: 8 for 4-byte dtypes, 16 for 2-byte, 32 for 1-byte.
    itemsize = jnp.dtype(dtype).itemsize
    return 8 * max(1, 4 // itemsize)


def _round_up(x: int, m: int) -> int:
    return ((x + m - 1) // m) * m


def _vmem_limit(block_bytes: int) -> int:
    # ~5x the block (in + out double-buffered + headroom), capped for v7x's
    # 64 MiB physical VMEM per TensorCore.
    return min(64 * 1024 * 1024, max(8 * 1024 * 1024, 5 * block_bytes))


def _abs_impl(x: jax.Array) -> jax.Array:
    if jnp.issubdtype(x.dtype, jnp.complexfloating):
        # TODO(synk): torch.abs(complex) returns a real-valued magnitude; a real
        # out_shape + |.| kernel would be needed.  Rejected explicitly here.
        raise NotImplementedError("abs_pallas does not support complex dtypes")

    orig_shape = x.shape
    dtype = x.dtype
    n = x.size
    if n == 0:
        return x

    itemsize = jnp.dtype(dtype).itemsize
    sublane = _packed_sublane(dtype)
    x_flat = x.reshape(-1)

    if n % _LANE == 0:
        # ---- Fast lane-dense 2D path (pure metadata reshape, no copies). ----
        W = _LANE
        rows = n // W
        tile_rows = max(
            sublane,
            ((_TARGET_BLOCK_BYTES // (itemsize * W)) // sublane) * sublane,
        )
        # Either a multiple of the packed sublane count, or the full row extent
        # (both satisfy the (sublane, 128) block constraint).
        tile_rows = min(tile_rows, rows)
        grid_n = pl.cdiv(rows, tile_rows)
        # v7x megacore: prefer an even grid count so both TCs get equal work.
        if grid_n > 1 and grid_n % 2 == 1:
            tile_rows = max(sublane, _round_up(pl.cdiv(rows, grid_n + 1), sublane))
            tile_rows = min(tile_rows, rows)
            grid_n = pl.cdiv(rows, tile_rows)

        block_bytes = tile_rows * W * itemsize
        x2d = x_flat.reshape(rows, W)
        out2d = pl.pallas_call(
            _abs_kernel,
            out_shape=jax.ShapeDtypeStruct((rows, W), dtype),
            grid=(grid_n,),
            in_specs=[pl.BlockSpec((tile_rows, W), lambda i: (i, 0))],
            out_specs=pl.BlockSpec((tile_rows, W), lambda i: (i, 0)),
            compiler_params=pltpu.CompilerParams(
                dimension_semantics=("parallel",),
                vmem_limit_bytes=_vmem_limit(block_bytes),
            ),
        )(x2d)
        return out2d.reshape(orig_shape)

    # ---- Unaligned path (n not a multiple of 128): no pad, no slice. --------
    # Stream the flat buffer in 1-D blocks; only the clipped final block uses
    # masked stores, so HBM traffic stays at the ideal 1 read + 1 write.
    tile_elems = sublane * _LANE
    chunk_elems = max(
        tile_elems,
        ((_TARGET_BLOCK_BYTES // itemsize) // tile_elems) * tile_elems,
    )
    if n <= chunk_elems:
        # Small input: single whole-array block (no grid).
        out = pl.pallas_call(
            _abs_kernel,
            out_shape=jax.ShapeDtypeStruct((n,), dtype),
        )(x_flat)
        return out.reshape(orig_shape)

    grid_n = pl.cdiv(n, chunk_elems)
    block_bytes = chunk_elems * itemsize
    out = pl.pallas_call(
        _abs_kernel,
        out_shape=jax.ShapeDtypeStruct((n,), dtype),
        grid=(grid_n,),
        in_specs=[pl.BlockSpec((chunk_elems,), lambda i: (i,))],
        out_specs=pl.BlockSpec((chunk_elems,), lambda i: (i,)),
        compiler_params=pltpu.CompilerParams(
            dimension_semantics=("parallel",),
            vmem_limit_bytes=_vmem_limit(block_bytes),
        ),
    )(x_flat)
    return out.reshape(orig_shape)


# jit so the flatten/reshape bookkeeping fuses with the kernel into one dispatch.
abs_pallas = jax.jit(_abs_impl)


if __name__ == "__main__":
    key = jax.random.PRNGKey(0)

    # Small NCHW input consistent with the module's usage: batch=2, C=4, H=W=16.
    x = jax.random.normal(key, (2, 4, 16, 16), dtype=jnp.float32)
    y = jax.block_until_ready(abs_pallas(x))
    assert y.shape == x.shape and y.dtype == x.dtype
    assert bool(jnp.allclose(y, jnp.abs(x))), "mismatch vs jnp.abs (f32 aligned path)"

    # Unaligned (not a multiple of 128 elements) path: no pad / slice copies.
    x2 = jax.random.normal(jax.random.PRNGKey(1), (3, 5, 7), dtype=jnp.float32)
    y2 = jax.block_until_ready(abs_pallas(x2))
    assert y2.shape == x2.shape and y2.dtype == x2.dtype
    assert bool(jnp.allclose(y2, jnp.abs(x2))), "mismatch vs jnp.abs (unaligned path)"

    # Narrow dtype path (bf16 -> 16-row packed sublanes).
    x3 = jax.random.normal(jax.random.PRNGKey(2), (8, 256), dtype=jnp.bfloat16)
    y3 = jax.block_until_ready(abs_pallas(x3))
    assert y3.shape == x3.shape and y3.dtype == x3.dtype
    assert bool(jnp.array_equal(y3, jnp.abs(x3))), "mismatch vs jnp.abs (bf16 path)"

    print("KERNEL_OK")
</pallas_src>

<mosaic_0001>
module attributes {stable_mosaic.version = 11 : i64} {
  func.func @_abs_kernel(%arg0: i32, %arg1: memref<16x128xf32, #tpu.memory_space<vmem>>, %arg2: memref<16x128xf32, #tpu.memory_space<vmem>>) attributes {dimension_semantics = [#tpu.dimension_semantics<parallel>], iteration_bounds = array<i64: 1>, scalar_prefetch = 0 : i64, scratch_operands = 0 : i64, tpu.core_type = #tpu.core_type<tc>, window_params = [{transform_indices = @transform_0, window_bounds = array<i64: 16, 128>}, {transform_indices = @transform_1, window_bounds = array<i64: 16, 128>}]} {
    %c0 = arith.constant 0 : index
    %c0_0 = arith.constant 0 : index
    %0 = vector.load %arg1[%c0, %c0_0] : memref<16x128xf32, #tpu.memory_space<vmem>>, vector<16x128xf32>
    %1 = math.absf %0 : vector<16x128xf32>
    %c0_1 = arith.constant 0 : index
    %c0_2 = arith.constant 0 : index
    %2 = vector.load %arg2[%c0_1, %c0_2] : memref<16x128xf32, #tpu.memory_space<vmem>>, vector<16x128xf32>
    tpu.vector_store %arg2[%c0_1, %c0_2], %1 {strides = array<i32>} : memref<16x128xf32, #tpu.memory_space<vmem>>, vector<16x128xf32>,
    return
  }
  func.func @transform_0(%arg0: i32) -> (i32, i32) {
    %c0_i32 = arith.constant 0 : i32
    %c0_i32_0 = arith.constant 0 : i32
    return %arg0, %c0_i32 : i32, i32
  }
  func.func @transform_1(%arg0: i32) -> (i32, i32) {
    %c0_i32 = arith.constant 0 : i32
    %c0_i32_0 = arith.constant 0 : i32
    return %arg0, %c0_i32 : i32, i32
  }
}

</mosaic_0001>

<bundles_post_ra>
// kernel: _abs_impl.1
= control target key start
LH: loop header
LB: loop body
LE: loop exit
PB: predicated region body
PF: predicated region fallthrough
CT: control target
= control target key end

     0   :  { %s40_s0 = inlined_call_operand.vmem [shape: f32[16,128], index: 0, kind: input, shape index: {}]   ;;  %s41_s1 = inlined_call_operand.vmem [shape: f32[16,128], index: 1, kind: output, shape index: {}]  }
   0x1   :  { %v8_v0 = vld [vmem:[%s40_s0] sm:$0xff]  ;;  %v9_v1 = vld [vmem:[%s40_s0 + $0x8] sm:$0xff] }
   0x2   :  { %v10_v2 = vand.u32 2147483647, %v8_v0  ;;  %v11_v3 = vand.u32 2147483647, %v9_v1 }
   0x4   :  { %12 = vst [vmem:[%s41_s1] sm:$0xff] %v10_v2 }
   0x5   :  { %13 = vst [vmem:[%s41_s1 + $0x8] sm:$0xff] %v11_v3 }

</bundles_post_ra>
